<compile_context>
chip_gen: v7x
topology: tpu7x:2x2x1
jax: 0.10.0
libtpu: 0.0.40
codegen_flags: <defaults>
</compile_context>

<pallas_src>
from functools import partial

import numpy as np
import jax
import jax.numpy as jnp
from jax.experimental import pallas as pl
from jax.experimental.pallas import tpu as pltpu

BN_EPS = 1e-5


def _round_up(a, b):
    return (a + b - 1) // b * b


# ---------------------------------------------------------------------------
# Fused kernel.
#   x_ref: (tr, 2, Wo, 2*Cin)  tile of the free view of the NHWC input
#   w_ref: (Cin, Cout)         conv weight with BN scale and 0.25 folded in
#   b_ref: (1, Cout)           BN shift with 0.25 folded in (f32)
#   o_ref: (tr, Wo, Cout)      pooled output tile
# For every output pixel it computes  sum_{hp,wp} relu(x_{hp,wp} @ W + b),
# which (with the folded 0.25) equals  mean_{2x2} relu(BN(conv1x1(x))).
# ---------------------------------------------------------------------------
def _fused_kernel(x_ref, w_ref, b_ref, o_ref, *, compute_dtype):
    tr, _, wo, c2 = x_ref.shape
    cin = c2 // 2
    cout = o_ref.shape[-1]

    w = w_ref[...]            # already compute_dtype
    b = b_ref[...]            # f32

    acc = jnp.zeros((tr * wo, cout), jnp.float32)
    for hp in range(2):                                   # unrolled: row taps
        # Select the row tap (major-dim index) and flatten pixels -> lane-dense 2-D.
        xh = x_ref[:, hp, :, :].reshape(tr * wo, c2)
        for wp in range(2):                               # unrolled: column taps
            xt = xh[:, wp * cin:(wp + 1) * cin].astype(compute_dtype)
            y = jnp.dot(xt, w, preferred_element_type=jnp.float32) + b
            acc = acc + jnp.maximum(y, 0.0)               # ReLU before pooling

    o_ref[...] = acc.reshape(tr, wo, cout).astype(o_ref.dtype)


# ---------------------------------------------------------------------------
# NHWC entry point (preferred: no layout transposes).
# ---------------------------------------------------------------------------
def transition_block_nhwc(x_nhwc, params, *, compute_dtype=jnp.bfloat16):
    """(N, H, W, Cin) -> (N, H//2, W//2, Cout).  compute_dtype=f32 gives exact
    f32 conv numerics; bf16 (default) is the fast path."""
    n, h, w_, cin = x_nhwc.shape
    cout = params["w"].shape[1]
    ho, wo = h // 2, w_ // 2
    out_dtype = x_nhwc.dtype
    if ho == 0 or wo == 0:
        return jnp.zeros((n, ho, wo, cout), out_dtype)

    # Fold eval-mode BN and the 2x2 average-pool 1/4 factor into weight/bias:
    #   mean_{2x2} relu(BN(x@w)) = sum_{2x2} relu(x @ (0.25*w*scale) + 0.25*shift)
    wf = params["w"].astype(jnp.float32)
    scale = params["gamma"].astype(jnp.float32) / jnp.sqrt(
        params["var"].astype(jnp.float32) + BN_EPS)
    w_folded = (0.25 * wf * scale[None, :]).astype(compute_dtype)       # (Cin, Cout)
    b_folded = (0.25 * (params["beta"].astype(jnp.float32)
                        - params["mean"].astype(jnp.float32) * scale)
                ).reshape(1, cout).astype(jnp.float32)                  # (1, Cout)

    x = x_nhwc[:, : 2 * ho, : 2 * wo, :]            # AvgPool2d floor behaviour
    xv = x.reshape(n * ho, 2, wo, 2 * cin)          # FREE view, no data movement
    rows = n * ho

    # --- generation-aware tiling -------------------------------------------
    bx = xv.dtype.itemsize
    bo = np.dtype(out_dtype).itemsize
    bw = np.dtype(compute_dtype).itemsize
    p2cin = _round_up(2 * cin, 128)
    pwo = _round_up(wo, 8)
    pcout = _round_up(cout, 128)
    per_tr_in = 2 * pwo * p2cin * bx                # bytes per view-row (padded)
    per_tr_out = pwo * pcout * bo
    fixed = 2 * (_round_up(cin, 8) * pcout * bw + 8 * pcout * 4)

    try:
        vmem_phys = int(pltpu.get_tpu_info().vmem_capacity_bytes)
    except Exception:
        vmem_phys = 64 << 20                        # v7x per-TC lower bound

    budget = int(vmem_phys * 0.55)
    tr_vmem = max(1, (budget - fixed) // (2 * (per_tr_in + per_tr_out)))
    tr_target = max(1, (6 << 20) // per_tr_in)      # ~6 MiB input tile
    tr_grid = max(1, pl.cdiv(rows, 4))              # >=4 steps: 2 TCs + pipelining
    tr = int(max(1, min(tr_target, tr_vmem, tr_grid, rows)))
    grid = (pl.cdiv(rows, tr),)                     # last block may be partial

    need = 2 * tr * (per_tr_in + per_tr_out) + fixed
    vmem_limit = int(min(max(2 * need + (8 << 20), 32 << 20),
                         int(vmem_phys * 0.9)))

    m_out = rows * wo
    cost = pl.CostEstimate(
        flops=8 * m_out * cin * cout,               # 4 taps x 2*Cin*Cout MACs
        transcendentals=0,
        bytes_accessed=int(xv.size * bx + w_folded.size * bw
                           + cout * 4 + m_out * cout * bo))

    out = pl.pallas_call(
        partial(_fused_kernel, compute_dtype=compute_dtype),
        out_shape=jax.ShapeDtypeStruct((rows, wo, cout), out_dtype),
        grid=grid,
        in_specs=[
            pl.BlockSpec((tr, 2, wo, 2 * cin), lambda i: (i, 0, 0, 0)),
            pl.BlockSpec((cin, cout), lambda i: (0, 0)),
            pl.BlockSpec((1, cout), lambda i: (0, 0)),
        ],
        out_specs=pl.BlockSpec((tr, wo, cout), lambda i: (i, 0, 0)),
        compiler_params=pltpu.CompilerParams(
            dimension_semantics=("parallel",),
            vmem_limit_bytes=vmem_limit,
        ),
        cost_estimate=cost,
    )(xv, w_folded, b_folded)

    return out.reshape(n, ho, wo, cout)


# ---------------------------------------------------------------------------
# NCHW entry point matching the PyTorch module's layout.  If the surrounding
# model is NHWC, call transition_block_nhwc directly and skip both transposes.
# ---------------------------------------------------------------------------
def transition_block_forward(x_nchw, params, *, compute_dtype=jnp.bfloat16):
    x = jnp.transpose(x_nchw, (0, 2, 3, 1))         # NCHW -> NHWC
    out = transition_block_nhwc(x, params, compute_dtype=compute_dtype)
    return jnp.transpose(out, (0, 3, 1, 2))          # NHWC -> NCHW


# ---------------------------------------------------------------------------
# Pure-JAX f32 reference (correctness check only).
# ---------------------------------------------------------------------------
def ref_forward(x_nchw, params):
    x = jnp.transpose(x_nchw, (0, 2, 3, 1)).astype(jnp.float32)
    y = jnp.einsum("nhwc,co->nhwo", x, params["w"].astype(jnp.float32))
    scale = params["gamma"] / jnp.sqrt(params["var"] + BN_EPS)
    shift = params["beta"] - params["mean"] * scale
    y = y * scale + shift
    y = jnp.maximum(y, 0.0)
    n, h, w, c = y.shape
    ho, wo = h // 2, w // 2
    y = y[:, : ho * 2, : wo * 2, :].reshape(n, ho, 2, wo, 2, c).mean(axis=(2, 4))
    return jnp.transpose(y, (0, 3, 1, 2)).astype(x_nchw.dtype)


# ---------------------------------------------------------------------------
# Deterministic parameter init matching the PyTorch module:
#   Conv2d(in, out, k=1, bias=False)  -> weight stored as (Cin, Cout) here
#   BatchNorm2d(out) defaults: gamma=1, beta=0, running_mean=0, running_var=1
# ---------------------------------------------------------------------------
def init_params(key, in_channels, out_channels):
    bound = 1.0 / np.sqrt(in_channels)
    w = jax.random.uniform(key, (in_channels, out_channels), jnp.float32,
                           -bound, bound)
    return {
        "w": w,
        "gamma": jnp.ones((out_channels,), jnp.float32),
        "beta": jnp.zeros((out_channels,), jnp.float32),
        "mean": jnp.zeros((out_channels,), jnp.float32),
        "var": jnp.ones((out_channels,), jnp.float32),
    }


if __name__ == "__main__":
    key = jax.random.PRNGKey(0)
    pkey, xkey = jax.random.split(key)
    in_channels, out_channels = 4, 8
    batch, height, width = 2, 16, 16

    params = init_params(pkey, in_channels, out_channels)
    x = jax.random.normal(xkey, (batch, in_channels, height, width), jnp.float32)

    out = jax.block_until_ready(transition_block_forward(x, params))
    assert out.shape == (batch, out_channels, height // 2, width // 2)

    ref = jax.block_until_ready(ref_forward(x, params))
    # bf16 matmul operands (f32 accumulation) vs. pure-f32 reference.
    np.testing.assert_allclose(np.asarray(out), np.asarray(ref),
                               rtol=3e-2, atol=3e-2)
    print("KERNEL_OK")
</pallas_src>

<mosaic_0001>
module attributes {stable_mosaic.version = 11 : i64} {
  func.func @_fused_kernel(%arg0: i32, %arg1: memref<4x2x8x8xf32, #tpu.memory_space<vmem>>, %arg2: memref<4x8xbf16, #tpu.memory_space<vmem>>, %arg3: memref<1x8xf32, #tpu.memory_space<vmem>>, %arg4: memref<4x8x8xf32, #tpu.memory_space<vmem>>) attributes {dimension_semantics = [#tpu.dimension_semantics<parallel>], iteration_bounds = array<i64: 4>, scalar_prefetch = 0 : i64, scratch_operands = 0 : i64, tpu.core_type = #tpu.core_type<tc>, window_params = [{transform_indices = @transform_0, window_bounds = array<i64: 4, 2, 8, 8>}, {pipeline_mode = #tpu.pipeline_mode<synchronous>, transform_indices = @transform_1, window_bounds = array<i64: 4, 8>}, {pipeline_mode = #tpu.pipeline_mode<synchronous>, transform_indices = @transform_2, window_bounds = array<i64: 1, 8>}, {transform_indices = @transform_3, window_bounds = array<i64: 4, 8, 8>}]} {
    %c0 = arith.constant 0 : index
    %c0_0 = arith.constant 0 : index
    %0 = vector.load %arg2[%c0, %c0_0] : memref<4x8xbf16, #tpu.memory_space<vmem>>, vector<4x8xbf16>
    %c0_1 = arith.constant 0 : index
    %c0_2 = arith.constant 0 : index
    %1 = vector.load %arg3[%c0_1, %c0_2] : memref<1x8xf32, #tpu.memory_space<vmem>>, vector<1x8xf32>
    %cst = arith.constant 0.000000e+00 : f32
    %2 = vector.broadcast %cst : f32 to vector<32x8xf32>
    %c0_3 = arith.constant 0 : index
    %c0_4 = arith.constant 0 : index
    %c0_5 = arith.constant 0 : index
    %c0_6 = arith.constant 0 : index
    %3 = vector.load %arg1[%c0_3, %c0_4, %c0_5, %c0_6] : memref<4x2x8x8xf32, #tpu.memory_space<vmem>>, vector<4x1x8x8xf32>
    %4 = vector.shape_cast %3 : vector<4x1x8x8xf32> to vector<4x8x8xf32>
    %5 = vector.shape_cast %4 : vector<4x8x8xf32> to vector<32x8xf32>
    %6 = vector.extract_strided_slice %5 {offsets = [0, 0], sizes = [32, 4], strides = [1, 1]} : vector<32x8xf32> to vector<32x4xf32>
    %7 = arith.truncf %6 : vector<32x4xf32> to vector<32x4xbf16>
    %cst_7 = arith.constant dense<0.000000e+00> : vector<32x8xf32>
    %8 = tpu.matmul %7, %0, %cst_7 {dimension_numbers = #tpu.dot_dimension_numbers<[1], [0], [0], [1], [0, 0, 1, 1], [], []>} : vector<32x4xbf16>, vector<4x8xbf16>, vector<32x8xf32> -> vector<32x8xf32>
    %9 = vector.broadcast %1 : vector<1x8xf32> to vector<32x8xf32>
    %10 = arith.addf %8, %9 : vector<32x8xf32>
    %cst_8 = arith.constant 0.000000e+00 : f32
    %11 = vector.broadcast %cst_8 : f32 to vector<32x8xf32>
    %12 = arith.maximumf %10, %11 : vector<32x8xf32>
    %13 = arith.addf %2, %12 : vector<32x8xf32>
    %14 = vector.extract_strided_slice %5 {offsets = [0, 4], sizes = [32, 4], strides = [1, 1]} : vector<32x8xf32> to vector<32x4xf32>
    %15 = arith.truncf %14 : vector<32x4xf32> to vector<32x4xbf16>
    %cst_9 = arith.constant dense<0.000000e+00> : vector<32x8xf32>
    %16 = tpu.matmul %15, %0, %cst_9 {dimension_numbers = #tpu.dot_dimension_numbers<[1], [0], [0], [1], [0, 0, 1, 1], [], []>} : vector<32x4xbf16>, vector<4x8xbf16>, vector<32x8xf32> -> vector<32x8xf32>
    %17 = vector.broadcast %1 : vector<1x8xf32> to vector<32x8xf32>
    %18 = arith.addf %16, %17 : vector<32x8xf32>
    %cst_10 = arith.constant 0.000000e+00 : f32
    %19 = vector.broadcast %cst_10 : f32 to vector<32x8xf32>
    %20 = arith.maximumf %18, %19 : vector<32x8xf32>
    %21 = arith.addf %13, %20 : vector<32x8xf32>
    %c0_11 = arith.constant 0 : index
    %c1 = arith.constant 1 : index
    %c0_12 = arith.constant 0 : index
    %c0_13 = arith.constant 0 : index
    %22 = vector.load %arg1[%c0_11, %c1, %c0_12, %c0_13] : memref<4x2x8x8xf32, #tpu.memory_space<vmem>>, vector<4x1x8x8xf32>
    %23 = vector.shape_cast %22 : vector<4x1x8x8xf32> to vector<4x8x8xf32>
    %24 = vector.shape_cast %23 : vector<4x8x8xf32> to vector<32x8xf32>
    %25 = vector.extract_strided_slice %24 {offsets = [0, 0], sizes = [32, 4], strides = [1, 1]} : vector<32x8xf32> to vector<32x4xf32>
    %26 = arith.truncf %25 : vector<32x4xf32> to vector<32x4xbf16>
    %cst_14 = arith.constant dense<0.000000e+00> : vector<32x8xf32>
    %27 = tpu.matmul %26, %0, %cst_14 {dimension_numbers = #tpu.dot_dimension_numbers<[1], [0], [0], [1], [0, 0, 1, 1], [], []>} : vector<32x4xbf16>, vector<4x8xbf16>, vector<32x8xf32> -> vector<32x8xf32>
    %28 = vector.broadcast %1 : vector<1x8xf32> to vector<32x8xf32>
    %29 = arith.addf %27, %28 : vector<32x8xf32>
    %cst_15 = arith.constant 0.000000e+00 : f32
    %30 = vector.broadcast %cst_15 : f32 to vector<32x8xf32>
    %31 = arith.maximumf %29, %30 : vector<32x8xf32>
    %32 = arith.addf %21, %31 : vector<32x8xf32>
    %33 = vector.extract_strided_slice %24 {offsets = [0, 4], sizes = [32, 4], strides = [1, 1]} : vector<32x8xf32> to vector<32x4xf32>
    %34 = arith.truncf %33 : vector<32x4xf32> to vector<32x4xbf16>
    %cst_16 = arith.constant dense<0.000000e+00> : vector<32x8xf32>
    %35 = tpu.matmul %34, %0, %cst_16 {dimension_numbers = #tpu.dot_dimension_numbers<[1], [0], [0], [1], [0, 0, 1, 1], [], []>} : vector<32x4xbf16>, vector<4x8xbf16>, vector<32x8xf32> -> vector<32x8xf32>
    %36 = vector.broadcast %1 : vector<1x8xf32> to vector<32x8xf32>
    %37 = arith.addf %35, %36 : vector<32x8xf32>
    %cst_17 = arith.constant 0.000000e+00 : f32
    %38 = vector.broadcast %cst_17 : f32 to vector<32x8xf32>
    %39 = arith.maximumf %37, %38 : vector<32x8xf32>
    %40 = arith.addf %32, %39 : vector<32x8xf32>
    %41 = vector.shape_cast %40 : vector<32x8xf32> to vector<4x8x8xf32>
    %c0_18 = arith.constant 0 : index
    %c0_19 = arith.constant 0 : index
    %c0_20 = arith.constant 0 : index
    %42 = vector.load %arg4[%c0_18, %c0_19, %c0_20] : memref<4x8x8xf32, #tpu.memory_space<vmem>>, vector<4x8x8xf32>
    tpu.vector_store %arg4[%c0_18, %c0_19, %c0_20], %41 {strides = array<i32>} : memref<4x8x8xf32, #tpu.memory_space<vmem>>, vector<4x8x8xf32>,
    return
  }
  func.func @transform_0(%arg0: i32) -> (i32, i32, i32, i32) {
    %c0_i32 = arith.constant 0 : i32
    %c0_i32_0 = arith.constant 0 : i32
    %c0_i32_1 = arith.constant 0 : i32
    %c0_i32_2 = arith.constant 0 : i32
    return %arg0, %c0_i32, %c0_i32_0, %c0_i32_1 : i32, i32, i32, i32
  }
  func.func @transform_1(%arg0: i32) -> (i32, i32) {
    %c0_i32 = arith.constant 0 : i32
    %c0_i32_0 = arith.constant 0 : i32
    %c0_i32_1 = arith.constant 0 : i32
    return %c0_i32, %c0_i32_0 : i32, i32
  }
  func.func @transform_2(%arg0: i32) -> (i32, i32) {
    %c0_i32 = arith.constant 0 : i32
    %c0_i32_0 = arith.constant 0 : i32
    %c0_i32_1 = arith.constant 0 : i32
    return %c0_i32, %c0_i32_0 : i32, i32
  }
  func.func @transform_3(%arg0: i32) -> (i32, i32, i32) {
    %c0_i32 = arith.constant 0 : i32
    %c0_i32_0 = arith.constant 0 : i32
    %c0_i32_1 = arith.constant 0 : i32
    return %arg0, %c0_i32, %c0_i32_0 : i32, i32, i32
  }
}

</mosaic_0001>

<bundles_post_ra>
// kernel: tpu_custom_call.1
= control target key start
LH: loop header
LB: loop body
LE: loop exit
PB: predicated region body
PF: predicated region fallthrough
CT: control target
= control target key end

     0   :  { %s633_s12 = smov 0   ;;  %s668_s0 = inlined_call_operand.vmem [shape: f32[16,2,8,8], index: 0, kind: input, shape index: {}]   ;;  %s669_s1 = inlined_call_operand.vmem [shape: bf16[4,8], index: 1, kind: input, shape index: {}]   ;;  %s670_s2 = inlined_call_operand.vmem [shape: f32[1,8], index: 2, kind: input, shape index: {}]   ;;  %s671_s3 = inlined_call_operand.vmem [shape: f32[16,8,8], index: 3, kind: output, shape index: {}]  }
   0x1 LB: > { %s529_s13 = sadd.s32 4294967295, %s610_s12   ;;  %p533_p0 = scmp.ge.s32.totalorder %s610_s12, 1  ;;  %s610_s12 = sphi %s633_s12, %s13_s12  }
   0x2   : > { %p139_p1 = scmp.lt.s32.totalorder %s610_s12, 5 }
   0x4   : > { %p140_p2 = pnand %p533_p0, %p139_p1 }
   0x5   : > { %s534_s14 = sshll.u32 (!%p140_p2), %s529_s13, 2  ;;  %v178_v0 = vld [vmem:[%s669_s1] sm:$0x3] (!%p140_p2)  ;;  %vm199_vm0 = vcmask (!%p140_p2), 1041408   ;;  %vm192_vm1 = vcmask (!%p140_p2), 31744   ;;  %s612_s21 = smov (!%p140_p2), 124  }
   0x6   : > { %143 = sbr.rel (%p140_p2) target bundleno = 368 (0x170), region = 32  ;;  %p165_p3 = scmp.lt.s32.totalorder (!%p140_p2), %s534_s14, 15  ;;  %591 = vmatprep.subr.msk.bf16.mxu0 (!%p140_p2), %vm199_vm0, %v178_v0  ;;  %v201_v1 = vsel (!%p140_p2), %vm199_vm0, %v178_v0, 0  ;;  %592 = vmatprep.subr.msk.bf16.mxu1 (!%p140_p2), %vm199_vm0, %v178_v0  ;;  %v539_v26 = vld [vmem:[%s670_s2] ss:$0 sm:$0xff] (!%p140_p2)  ;;  %vm468_vm2 = vcmask (!%p140_p2), 64512  }
   0x7   : > { %568 = vmatpush3.bf16.msra.mxu0 (!%p140_p2), %v201_v1  ;;  %574 = vmatpush3.bf16.msra.mxu1 (!%p140_p2), %v201_v1 }
   0x8   : > { %593 = vmatprep.subr.msk.bf16.mxu0 (!%p140_p2), %vm199_vm0, %v178_v0  ;;  %594 = vmatprep.subr.msk.bf16.mxu1 (!%p140_p2), %vm199_vm0, %v178_v0 }
   0xd   : > { %s673_s14 = smov (!%p165_p3, %s534_s14), 15 }
   0xe   : > { %s554_s17 = sshll.u32 %s673_s14, 4  ;;  %s538_s24 = sshll.u32 %s673_s14, 3 }
   0xf   : > { %s169_s20 = scalar_lea.vmem %s668_s0, %s554_s17  ;;  %s175_s27 = scalar_lea.vmem %s671_s3, %s538_s24 }
  0x10   : > { %v180_v2 = vld [vmem:[%s169_s20] sm:$0xff]  ;;  %v181_v3 = vld [vmem:[%s169_s20 + $0x10] sm:$0xff]  ;;  %v544_v7 = vld [vmem:[%s169_s20 + $0x8] sm:$0xff] }
  0x11   : > { %v182_v4 = vld [vmem:[%s169_s20 + $0x20] sm:$0xff]  ;;  %v184_v5 = vpack.c.bf16 %v181_v3, %v180_v2  ;;  %v183_v6 = vld [vmem:[%s169_s20 + $0x30] sm:$0xff]  ;;  %v545_v8 = vld [vmem:[%s169_s20 + $0x18] sm:$0xff] }
  0x12   : > { %v185_v9 = vpack.c.bf16 %v183_v6, %v182_v4  ;;  %v334_v10 = vpack.c.bf16 %v545_v8, %v544_v7  ;;  %v546_v11 = vld [vmem:[%s169_s20 + $0x28] sm:$0xff]  ;;  %v547_v12 = vld [vmem:[%s169_s20 + $0x38] sm:$0xff] }
  0x13   : > { %262 = vrot.lane.b32.xlu0 %v184_v5, %s612_s21  ;;  %569 = vmatprep.mubr.msk.bf16.mxu0 %vm192_vm1, %v184_v5  ;;  %v335_v13 = vpack.c.bf16 %v547_v12, %v546_v11 }
  0x14   : > { %401 = vrot.lane.b32.xlu1 %v334_v10, %s612_s21  ;;  %570 = vmatmul.mubr.msk.bf16.vlgmr.msra.gmra.mrb[0].mxu0 %vm192_vm1, %v185_v9 }
  0x15   : > { %580 = vmatpush3.bf16.msra.mxu0 %v201_v1  ;;  %581 = vmatprep.mubr.msk.bf16.mxu0 %vm192_vm1, %v334_v10 }
  0x17   : > { %264 = vrot.lane.b32.xlu0 %v185_v9, %s612_s21 }
  0x18   : > { %403 = vrot.lane.b32.xlu1 %v335_v13, %s612_s21 }
  0x1c   : > { %582 = vmatmul.mubr.msk.bf16.vlgmr.msra.gmra.mrb[4].mxu0 %vm192_vm1, %v335_v13 }
  0x85   : > { %v263_v14 = vpop.permute.xlu0 %262 }
  0x86   : > { %575 = vmatprep.mubr.msk.bf16.mxu1 %vm192_vm1, %v263_v14  ;;  %v402_v15 = vpop.permute.xlu1 %401 }
  0x89   : > { %v265_v16 = vpop.permute.xlu0 %264 }
  0x8a   : > { %576 = vmatmul.mubr.msk.bf16.vlgmr.msra.gmra.mrb[0].mxu1 %vm192_vm1, %v265_v16  ;;  %v404_v17 = vpop.permute.xlu1 %403 }
  0x8b   : > { %586 = vmatpush3.bf16.msra.mxu1 %v201_v1  ;;  %587 = vmatprep.mubr.msk.bf16.mxu1 %vm192_vm1, %v402_v15 }
  0x92   : > { %588 = vmatmul.mubr.msk.bf16.vlgmr.msra.gmra.mrb[4].mxu1 %vm192_vm1, %v404_v17 }
  0xe7   : > { %v571_v18 = vpop.f32.mrb[0].mxu0 }
  0xe8   : > { %v237_v19 = vpop.f32.mrb[1].mxu0  ;;  %v246_v27 = vadd.f32 %v571_v18, %v539_v26 }
  0xe9   : > { %v572_v20 = vpop.f32.mrb[2].mxu0  ;;  %v238_v29 = vadd.f32 %v539_v26, %v237_v19 }
  0xea   : > { %v240_v21 = vpop.f32.mrb[3].mxu0  ;;  %v249_v32 = vadd.f32 %v572_v20, %v539_v26  ;;  %v254_v40 = vmax.f32 %v246_v27, 0.0 }
  0xeb   : > { %v241_v36 = vadd.f32 %v539_v26, %v240_v21  ;;  %v252_v45 = vmax.f32 %v238_v29, 0.0 }
  0xec   : > { %v255_v49 = vmax.f32 %v249_v32, 0.0 }
  0xed   : > { %v253_v53 = vmax.f32 %v241_v36, 0.0 }
  0xef   : > { %v583_v22 = vpop.f32.mrb[4].mxu0 }
  0xf0   : > { %v376_v23 = vpop.f32.mrb[5].mxu0  ;;  %v385_v28 = vadd.f32 %v583_v22, %v539_v26 }
  0xf1   : > { %v584_v24 = vpop.f32.mrb[6].mxu0  ;;  %v377_v31 = vadd.f32 %v539_v26, %v376_v23 }
  0xf2   : > { %v379_v25 = vpop.f32.mrb[7].mxu0  ;;  %v388_v35 = vadd.f32 %v584_v24, %v539_v26  ;;  %v393_v43 = vmax.f32 %v385_v28, 0.0 }
  0xf3   : > { %v380_v39 = vadd.f32 %v539_v26, %v379_v25  ;;  %v391_v48 = vmax.f32 %v377_v31, 0.0 }
  0xf4   : > { %v394_v52 = vmax.f32 %v388_v35, 0.0 }
  0xf5   : > { %v392_v56 = vmax.f32 %v380_v39, 0.0 }
 0x15d   : > { %v577_v30 = vpop.f32.mrb[0].mxu1 }
 0x15e   : > { %v315_v33 = vadd.f32 %v577_v30, %v539_v26  ;;  %v306_v34 = vpop.f32.mrb[1].mxu1 }
 0x15f   : > { %v307_v37 = vadd.f32 %v539_v26, %v306_v34  ;;  %v578_v38 = vpop.f32.mrb[2].mxu1 }
 0x160   : > { %v323_v41 = vmax.f32 %v315_v33, 0.0  ;;  %v318_v42 = vadd.f32 %v578_v38, %v539_v26  ;;  %v309_v44 = vpop.f32.mrb[3].mxu1 }
 0x161   : > { %v321_v46 = vmax.f32 %v307_v37, 0.0  ;;  %v310_v47 = vadd.f32 %v539_v26, %v309_v44 }
 0x162   : > { %v327_v50 = vadd.f32 %v323_v41, %v254_v40  ;;  %v324_v51 = vmax.f32 %v318_v42, 0.0 }
 0x163   : > { %v325_v54 = vadd.f32 %v321_v46, %v252_v45  ;;  %v322_v55 = vmax.f32 %v310_v47, 0.0 }
 0x164   : > { %v328_v57 = vadd.f32 %v324_v51, %v255_v49  ;;  %v397_v58 = vadd.f32 %v393_v43, %v327_v50 }
 0x165   : > { %v326_v59 = vadd.f32 %v322_v55, %v253_v53  ;;  %v395_v60 = vadd.f32 %v391_v48, %v325_v54  ;;  %v589_v61 = vpop.f32.mrb[4].mxu1 }
 0x166   : > { %v398_v62 = vadd.f32 %v394_v52, %v328_v57  ;;  %v454_v63 = vadd.f32 %v589_v61, %v539_v26  ;;  %v445_v0 = vpop.f32.mrb[5].mxu1 }
 0x167   : > { %v396_v1 = vadd.f32 %v392_v56, %v326_v59  ;;  %v446_v2 = vadd.f32 %v539_v26, %v445_v0  ;;  %v590_v3 = vpop.f32.mrb[6].mxu1 }
 0x168   : > { %v462_v4 = vmax.f32 %v454_v63, 0.0  ;;  %v457_v5 = vadd.f32 %v590_v3, %v539_v26  ;;  %v448_v6 = vpop.f32.mrb[7].mxu1 }
 0x169   : > { %v460_v7 = vmax.f32 %v446_v2, 0.0  ;;  %v449_v8 = vadd.f32 %v539_v26, %v448_v6 }
 0x16a   : > { %v466_v9 = vadd.f32 %v462_v4, %v397_v58  ;;  %v463_v10 = vmax.f32 %v457_v5, 0.0 }
 0x16b   : > { %v464_v11 = vadd.f32 %v460_v7, %v395_v60  ;;  %v461_v12 = vmax.f32 %v449_v8, 0.0 }
 0x16c   : > { %471 = vst.msk [vmem:[%s175_s27 + $0x10] sm:$0xff] %vm468_vm2, %v466_v9  ;;  %v467_v13 = vadd.f32 %v463_v10, %v398_v62 }
 0x16d   : > { %469 = vst.msk [vmem:[%s175_s27] sm:$0xff] %vm468_vm2, %v464_v11  ;;  %v465_v14 = vadd.f32 %v461_v12, %v396_v1 }
 0x16e   : > { %472 = vst.msk [vmem:[%s175_s27 + $0x18] sm:$0xff] %vm468_vm2, %v467_v13 }
 0x16f   : > { %470 = vst.msk [vmem:[%s175_s27 + $0x8] sm:$0xff] %vm468_vm2, %v465_v14 }
 0x170 PF: > { %s13_s12 = sadd.s32 1, %s610_s12  }
 0x171   : > { %p10_p4 = scmp.ge.s32.totalorder %s13_s12, 6  }
 0x173   :  { %12 = sbr.rel (!%p10_p4) target bundleno = 1 (0x1), region = 63 }

</bundles_post_ra>
